<compile_context>
chip_gen: v6e
topology: v6e:2x2x1
jax: 0.10.0
libtpu: 0.0.40
codegen_flags: <defaults>
</compile_context>

<pallas_src>
import functools

import jax
import jax.numpy as jnp
from jax import lax
from jax.experimental import pallas as pl
from jax.experimental.pallas import tpu as pltpu

EPS = 1e-5  # nn.BatchNorm1d default
_MIB = 1024 * 1024


# --------------------------------------------------------------------------------------
# Kernels
# --------------------------------------------------------------------------------------
def _fused_kernel(x_ref, gamma_ref, beta_ref, o_ref, *, eps):
    """Single-pass path: whole (N, C, L) slice resident in VMEM (one read, one write)."""
    x = x_ref[...].astype(jnp.float32)                       # (N, C, L)
    inv_count = 1.0 / float(x.shape[0] * x.shape[2])
    s1 = jnp.sum(x, axis=0)                                  # (C, L)
    s2 = jnp.sum(x * x, axis=0)                              # (C, L)
    mean = jnp.sum(s1, axis=1, keepdims=True) * inv_count    # (C, 1)
    var = jnp.sum(s2, axis=1, keepdims=True) * inv_count - mean * mean
    inv = lax.rsqrt(var + eps)
    scale = gamma_ref[...] * inv                             # (C, 1)
    shift = beta_ref[...] - mean * scale
    o_ref[...] = (x * scale[None, :, :] + shift[None, :, :]).astype(o_ref.dtype)


def _stats_kernel(x_ref, gamma_ref, beta_ref, scale_ref, shift_ref,
                  sum_sc, sq_sc, *, inv_count, eps, n_total, tile_n, needs_mask):
    """Pass 1: accumulate per-(channel, lane) sums; finalize fused scale/shift."""
    n = pl.program_id(1)

    @pl.when(n == 0)
    def _():
        sum_sc[...] = jnp.zeros_like(sum_sc)
        sq_sc[...] = jnp.zeros_like(sq_sc)

    x = x_ref[...].astype(jnp.float32)                       # (tile_n, tc, L)
    if needs_mask:  # masked tail (cdiv grid), only traced when N % tile_n != 0
        rows = lax.broadcasted_iota(jnp.int32, (tile_n, 1, 1), 0)
        valid = n_total - n * tile_n
        x = jnp.where(rows < valid, x, 0.0)

    # Plain VALU adds per tile; the cross-lane (L) reduce is deferred to the finalize.
    sum_sc[...] += jnp.sum(x, axis=0)                        # (tc, L)
    sq_sc[...] += jnp.sum(x * x, axis=0)                     # (tc, L)

    @pl.when(n == pl.num_programs(1) - 1)
    def _():
        s1 = jnp.sum(sum_sc[...], axis=1, keepdims=True)     # (tc, 1)  XLU reduce, once
        s2 = jnp.sum(sq_sc[...], axis=1, keepdims=True)
        mean = s1 * inv_count
        var = s2 * inv_count - mean * mean                   # biased variance
        inv = lax.rsqrt(var + eps)
        scale = gamma_ref[...] * inv                         # (tc, 1)
        shift = beta_ref[...] - mean * scale
        # Lane-expanded write so pass 2 can consume a flat (1, C*L) view.
        scale_ref[...] = jnp.broadcast_to(scale, scale_ref.shape)
        shift_ref[...] = jnp.broadcast_to(shift, shift_ref.shape)


def _norm_kernel(x_ref, scale_ref, shift_ref, o_ref):
    """Pass 2: lane-dense y = x * scale + shift, computed in x's dtype."""
    x = x_ref[...]                                           # (tn2, tcl)
    s = scale_ref[...].astype(x.dtype)                       # (1, tcl)
    b = shift_ref[...].astype(x.dtype)
    o_ref[...] = x * s + b


# --------------------------------------------------------------------------------------
# Tiling / dispatch helpers
# --------------------------------------------------------------------------------------
def _vmem_capacity_bytes():
    try:
        return int(getattr(pltpu.get_tpu_info(), "vmem_capacity_bytes", 64 * _MIB))
    except Exception:
        return 64 * _MIB  # most conservative generation (v7x)


def _round_down(x, m):
    return (x // m) * m


def _pick_stats_tiles(n, c, l, itemsize, budget):
    """Channel tile (multiple of 8, or full C) and row tile for the stats pass."""
    tc = c // 2 if (c % 16 == 0) else c   # two channel tiles => both v7x cores busy in pass 1
    if tc % 8 == 0:
        while tc > 8 and tc * l * itemsize > budget:
            tc -= 8
    # TODO(synk): if even a (1, tc, L) block exceeds the budget (huge C*L) we rely on the
    #             raised vmem_limit_bytes headroom rather than also tiling L in the stats pass.
    tn = max(1, min(n, budget // max(1, tc * l * itemsize)))
    return tn, tc


def _pick_norm_tiles(n, cl, itemsize, budget):
    """Lane-dense (rows, lanes) tiles for the normalize pass."""
    if n * cl * itemsize <= budget:
        return n, cl
    if 8 * cl * itemsize <= budget:
        tcl = cl
    else:
        tcl = min(cl, max(128, _round_down(budget // (8 * itemsize), 128)))
    rows = budget // max(1, tcl * itemsize)
    tn = n if rows >= n else min(n, max(8, _round_down(rows, 8)))
    return tn, tcl


# --------------------------------------------------------------------------------------
# Per-element forward
# --------------------------------------------------------------------------------------
def _bn1d_single(x, gamma, beta, *, block_budget, single_pass_max, vmem_limit):
    N, C, L = x.shape
    gam = gamma.astype(jnp.float32).reshape(C, 1)
    bet = beta.astype(jnp.float32).reshape(C, 1)
    itemsize = x.dtype.itemsize

    # ---- Path A: whole slice fits in VMEM -> single pass (2 HBM sweeps instead of 3) ----
    if N * C * L * max(itemsize, 4) <= single_pass_max:
        return pl.pallas_call(
            functools.partial(_fused_kernel, eps=EPS),
            out_shape=jax.ShapeDtypeStruct((N, C, L), x.dtype),
            compiler_params=pltpu.CompilerParams(vmem_limit_bytes=vmem_limit),
        )(x, gam, bet)

    # ---- Path B: two streaming passes ----
    tn, tc = _pick_stats_tiles(N, C, L, itemsize, block_budget)
    n_tiles = pl.cdiv(N, tn)
    c_tiles = pl.cdiv(C, tc)
    inv_count = 1.0 / float(N * L)

    # Pass 1: per-channel statistics -> fused affine (scale, shift), lane-expanded to (C, L).
    scale_cl, shift_cl = pl.pallas_call(
        functools.partial(_stats_kernel, inv_count=inv_count, eps=EPS,
                          n_total=N, tile_n=tn, needs_mask=(N % tn != 0)),
        out_shape=(jax.ShapeDtypeStruct((C, L), jnp.float32),
                   jax.ShapeDtypeStruct((C, L), jnp.float32)),
        grid_spec=pltpu.PrefetchScalarGridSpec(
            num_scalar_prefetch=0,
            grid=(c_tiles, n_tiles),
            in_specs=[
                pl.BlockSpec((tn, tc, L), lambda c, n: (n, c, 0)),
                pl.BlockSpec((tc, 1), lambda c, n: (c, 0)),
                pl.BlockSpec((tc, 1), lambda c, n: (c, 0)),
            ],
            out_specs=[
                pl.BlockSpec((tc, L), lambda c, n: (c, 0)),
                pl.BlockSpec((tc, L), lambda c, n: (c, 0)),
            ],
            scratch_shapes=[pltpu.VMEM((tc, L), jnp.float32),
                            pltpu.VMEM((tc, L), jnp.float32)],
        ),
        compiler_params=pltpu.CompilerParams(
            dimension_semantics=("parallel", "arbitrary"),
            vmem_limit_bytes=vmem_limit),
    )(x, gam, bet)

    # Pass 2: lane-dense normalize.  (N, C, L) -> (N, C*L) is a free contiguous reshape.
    CL = C * L
    x2 = x.reshape(N, CL)
    scale2 = scale_cl.reshape(1, CL)
    shift2 = shift_cl.reshape(1, CL)

    tn2, tcl = _pick_norm_tiles(N, CL, itemsize, block_budget)
    out2 = pl.pallas_call(
        _norm_kernel,
        out_shape=jax.ShapeDtypeStruct((N, CL), x.dtype),
        grid_spec=pltpu.PrefetchScalarGridSpec(
            num_scalar_prefetch=0,
            grid=(pl.cdiv(N, tn2), pl.cdiv(CL, tcl)),
            in_specs=[
                pl.BlockSpec((tn2, tcl), lambda i, j: (i, j)),
                pl.BlockSpec((1, tcl), lambda i, j: (0, j)),
                pl.BlockSpec((1, tcl), lambda i, j: (0, j)),
            ],
            out_specs=pl.BlockSpec((tn2, tcl), lambda i, j: (i, j)),
        ),
        compiler_params=pltpu.CompilerParams(
            dimension_semantics=("parallel", "parallel"),
            vmem_limit_bytes=vmem_limit),
    )(x2, scale2, shift2)
    return out2.reshape(N, C, L)


# --------------------------------------------------------------------------------------
# Public wrapper: list in, list out (matches the PyTorch module forward)
# --------------------------------------------------------------------------------------
def batchnorm1d_parallel(x_parallel, gammas, betas, *,
                         block_budget_bytes=None, single_pass_max_bytes=None):
    """x_parallel: list/tuple of P arrays (N, C, L) (or a stacked (P, N, C, L) array).
    gammas / betas: (P, C).  Returns a list of P arrays (N, C, L)."""
    if not isinstance(x_parallel, (list, tuple)):
        x_parallel = [x_parallel[p] for p in range(x_parallel.shape[0])]

    cap = _vmem_capacity_bytes()
    big = cap >= 128 * _MIB
    vmem_limit = 96 * _MIB if big else 48 * _MIB
    block_budget = (8 * _MIB if big else 4 * _MIB) \
        if block_budget_bytes is None else block_budget_bytes
    single_pass_max = block_budget if single_pass_max_bytes is None else single_pass_max_bytes

    return [
        _bn1d_single(xp, gammas[p], betas[p],
                     block_budget=block_budget,
                     single_pass_max=single_pass_max,
                     vmem_limit=vmem_limit)
        for p, xp in enumerate(x_parallel)
    ]


# --------------------------------------------------------------------------------------
# Reference & self-test
# --------------------------------------------------------------------------------------
def _reference(x_list, gammas, betas):
    outs = []
    for p, x in enumerate(x_list):
        xf = x.astype(jnp.float32)
        mean = jnp.mean(xf, axis=(0, 2), keepdims=True)
        var = jnp.mean((xf - mean) ** 2, axis=(0, 2), keepdims=True)
        y = (xf - mean) / jnp.sqrt(var + EPS)
        y = y * gammas[p][None, :, None] + betas[p][None, :, None]
        outs.append(y.astype(x.dtype))
    return outs


def _check(outs, refs, tol=1e-4):
    for o, r in zip(outs, refs):
        assert o.shape == r.shape and o.dtype == r.dtype
        err = float(jnp.max(jnp.abs(o.astype(jnp.float32) - r.astype(jnp.float32))))
        assert err < tol, f"max abs err {err}"


if __name__ == "__main__":
    key = jax.random.PRNGKey(0)
    k_x, k_g, k_b, k_x2 = jax.random.split(key, 4)

    # ---- Config A: small slices -> single-pass VMEM-resident path ----
    P, N, C, L = 2, 4, 32, 8
    xs = jax.random.normal(k_x, (P, N, C, L), dtype=jnp.float32)
    x_list = [xs[p] for p in range(P)]
    gammas = 1.0 + 0.1 * jax.random.normal(k_g, (P, C), dtype=jnp.float32)
    betas = 0.1 * jax.random.normal(k_b, (P, C), dtype=jnp.float32)

    outs = batchnorm1d_parallel(x_list, gammas, betas)
    outs = [jax.block_until_ready(o) for o in outs]
    _check(outs, _reference(x_list, gammas, betas))

    # ---- Config B: force the tiled two-pass path via tiny budgets; odd N exercises the
    #      masked stats tail, and C*L > lane tile exercises the lane-tiled normalize ----
    N2 = 5
    x_b = [jax.random.normal(k_x2, (N2, C, L), dtype=jnp.float32)]
    outs_b = batchnorm1d_parallel(x_b, gammas[:1], betas[:1],
                                  block_budget_bytes=1024,
                                  single_pass_max_bytes=0)
    outs_b = [jax.block_until_ready(o) for o in outs_b]
    _check(outs_b, _reference(x_b, gammas[:1], betas[:1]))

    print("KERNEL_OK")
</pallas_src>

<mosaic_0001>
module attributes {stable_mosaic.version = 11 : i64} {
  func.func @_fused_kernel(%arg0: memref<4x32x8xf32, #tpu.memory_space<vmem>>, %arg1: memref<32x1xf32, #tpu.memory_space<vmem>>, %arg2: memref<32x1xf32, #tpu.memory_space<vmem>>, %arg3: memref<4x32x8xf32, #tpu.memory_space<vmem>>) attributes {dimension_semantics = [], scalar_prefetch = 0 : i64, scratch_operands = 0 : i64, tpu.core_type = #tpu.core_type<tc>} {
    %c0 = arith.constant 0 : index
    %c0_0 = arith.constant 0 : index
    %c0_1 = arith.constant 0 : index
    %0 = vector.load %arg0[%c0, %c0_0, %c0_1] : memref<4x32x8xf32, #tpu.memory_space<vmem>>, vector<4x32x8xf32>
    %cst = arith.constant dense<0.000000e+00> : vector<32x8xf32>
    %1 = vector.multi_reduction <add>, %0, %cst [0] : vector<4x32x8xf32> to vector<32x8xf32>
    %2 = arith.mulf %0, %0 : vector<4x32x8xf32>
    %cst_2 = arith.constant dense<0.000000e+00> : vector<32x8xf32>
    %3 = vector.multi_reduction <add>, %2, %cst_2 [0] : vector<4x32x8xf32> to vector<32x8xf32>
    %cst_3 = arith.constant dense<0.000000e+00> : vector<32xf32>
    %4 = vector.multi_reduction <add>, %1, %cst_3 [1] : vector<32x8xf32> to vector<32xf32>
    %5 = vector.shape_cast %4 : vector<32xf32> to vector<32x1xf32>
    %cst_4 = arith.constant 3.125000e-02 : f32
    %6 = vector.broadcast %cst_4 : f32 to vector<32x1xf32>
    %7 = arith.mulf %5, %6 : vector<32x1xf32>
    %cst_5 = arith.constant dense<0.000000e+00> : vector<32xf32>
    %8 = vector.multi_reduction <add>, %3, %cst_5 [1] : vector<32x8xf32> to vector<32xf32>
    %9 = vector.shape_cast %8 : vector<32xf32> to vector<32x1xf32>
    %cst_6 = arith.constant 3.125000e-02 : f32
    %10 = vector.broadcast %cst_6 : f32 to vector<32x1xf32>
    %11 = arith.mulf %9, %10 : vector<32x1xf32>
    %12 = arith.mulf %7, %7 : vector<32x1xf32>
    %13 = arith.subf %11, %12 : vector<32x1xf32>
    %cst_7 = arith.constant 9.99999974E-6 : f32
    %14 = vector.broadcast %cst_7 : f32 to vector<32x1xf32>
    %15 = arith.addf %13, %14 : vector<32x1xf32>
    %16 = math.rsqrt %15 : vector<32x1xf32>
    %c0_8 = arith.constant 0 : index
    %c0_9 = arith.constant 0 : index
    %17 = vector.load %arg1[%c0_8, %c0_9] : memref<32x1xf32, #tpu.memory_space<vmem>>, vector<32x1xf32>
    %18 = arith.mulf %17, %16 : vector<32x1xf32>
    %c0_10 = arith.constant 0 : index
    %c0_11 = arith.constant 0 : index
    %19 = vector.load %arg2[%c0_10, %c0_11] : memref<32x1xf32, #tpu.memory_space<vmem>>, vector<32x1xf32>
    %20 = arith.mulf %7, %18 : vector<32x1xf32>
    %21 = arith.subf %19, %20 : vector<32x1xf32>
    %22 = vector.shape_cast %18 : vector<32x1xf32> to vector<1x32x1xf32>
    %23 = vector.broadcast %22 : vector<1x32x1xf32> to vector<4x32x8xf32>
    %24 = arith.mulf %0, %23 : vector<4x32x8xf32>
    %25 = vector.shape_cast %21 : vector<32x1xf32> to vector<1x32x1xf32>
    %26 = vector.broadcast %25 : vector<1x32x1xf32> to vector<4x32x8xf32>
    %27 = arith.addf %24, %26 : vector<4x32x8xf32>
    %c0_12 = arith.constant 0 : index
    %c0_13 = arith.constant 0 : index
    %c0_14 = arith.constant 0 : index
    %28 = vector.load %arg3[%c0_12, %c0_13, %c0_14] : memref<4x32x8xf32, #tpu.memory_space<vmem>>, vector<4x32x8xf32>
    tpu.vector_store %arg3[%c0_12, %c0_13, %c0_14], %27 {strides = array<i32>} : memref<4x32x8xf32, #tpu.memory_space<vmem>>, vector<4x32x8xf32>,
    return
  }
}

</mosaic_0001>

<bundles_post_ra>
// kernel: tpu_custom_call.1
= control target key start
LH: loop header
LB: loop body
LE: loop exit
PB: predicated region body
PF: predicated region fallthrough
CT: control target
= control target key end

     0   :  { %vm30_vm0 = vcmask 64512   ;;  %s570_s0 = inlined_call_operand.vmem [shape: f32[4,32,8], index: 0, kind: input, shape index: {}]   ;;  %s571_s1 = inlined_call_operand.vmem [shape: f32[32,1], index: 1, kind: input, shape index: {}]   ;;  %s572_s2 = inlined_call_operand.vmem [shape: f32[32,1], index: 2, kind: input, shape index: {}]   ;;  %s573_s3 = inlined_call_operand.vmem [shape: f32[4,32,8], index: 3, kind: output, shape index: {}]  }
   0x1   :  { %v298_v0 = vld [vmem:[%s570_s0 + $0x10] sm:$0xff]  ;;  %v324_v7 = vld [vmem:[%s570_s0] sm:$0xff]  ;;  %v354_v16 = vld [vmem:[%s570_s0 + $0x18] sm:$0xff] }
   0x2   :  { %v303_v1 = vld [vmem:[%s570_s0 + $0x30] sm:$0xff]  ;;  %v45_v4 = vsel %vm30_vm0, %v298_v0, 0.0  ;;  %v329_v8 = vld [vmem:[%s570_s0 + $0x20] sm:$0xff]  ;;  %v333_v9 = vmul.f32 %v298_v0, %v298_v0  ;;  %v31_v14 = vsel %vm30_vm0, %v324_v7, 0.0  ;;  %v363_v20 = vld [vmem:[%s570_s0 + $0x38] sm:$0xff]  ;;  %v52_v23 = vsel %vm30_vm0, %v354_v16, 0.0 }
   0x3   :  { %v308_v2 = vld [vmem:[%s570_s0 + $0x50] sm:$0xff]  ;;  %v46_v5 = vsel %vm30_vm0, %v303_v1, 0.0  ;;  %v340_v12 = vld [vmem:[%s570_s0 + $0x40] sm:$0xff]  ;;  %v32_v15 = vsel %vm30_vm0, %v329_v8, 0.0  ;;  %v368_v21 = vld [vmem:[%s570_s0 + $0x58] sm:$0xff]  ;;  %v53_v25 = vsel %vm30_vm0, %v363_v20, 0.0  ;;  %v59_v57 = vmul.f32 %v324_v7, %v324_v7 }
   0x4   :  { %v313_v3 = vld [vmem:[%s570_s0 + $0x70] sm:$0xff]  ;;  %v48_v6 = vsel %vm30_vm0, %v308_v2, 0.0  ;;  %v47_v10 = vadd.f32 %v46_v5, %v45_v4  ;;  %v345_v13 = vld [vmem:[%s570_s0 + $0x60] sm:$0xff]  ;;  %v33_v17 = vadd.f32 %v32_v15, %v31_v14  ;;  %v34_v18 = vsel %vm30_vm0, %v340_v12, 0.0  ;;  %v373_v22 = vld [vmem:[%s570_s0 + $0x78] sm:$0xff] }
   0x5   :  { %v50_v11 = vsel %vm30_vm0, %v313_v3, 0.0  ;;  %v36_v19 = vsel %vm30_vm0, %v345_v13, 0.0  ;;  %v55_v26 = vsel %vm30_vm0, %v368_v21, 0.0  ;;  %v57_v27 = vsel %vm30_vm0, %v373_v22, 0.0  ;;  %v386_v28 = vld [vmem:[%s570_s0 + $0x8] sm:$0xff] }
   0x6   :  { %v49_v24 = vadd.f32 %v48_v6, %v47_v10  ;;  %v391_v29 = vld [vmem:[%s570_s0 + $0x28] sm:$0xff]  ;;  %v35_v31 = vadd.f32 %v34_v18, %v33_v17  ;;  %v54_v32 = vadd.f32 %v53_v25, %v52_v23  ;;  %v38_v34 = vsel %vm30_vm0, %v386_v28, 0.0 }
   0x7   :  { %v396_v30 = vld [vmem:[%s570_s0 + $0x48] sm:$0xff]  ;;  %v39_v35 = vsel %vm30_vm0, %v391_v29, 0.0  ;;  %v60_v42 = vmul.f32 %v386_v28, %v386_v28  ;;  %v64_v43 = vmul.f32 %v391_v29, %v391_v29  ;;  %v63_v58 = vmul.f32 %v329_v8, %v329_v8 }
   0x8   :  { %v401_v33 = vld [vmem:[%s570_s0 + $0x68] sm:$0xff]  ;;  %v51_v36 = vadd.f32 %v50_v11, %v49_v24  ;;  %v40_v37 = vadd.f32 %v39_v35, %v38_v34  ;;  %v41_v38 = vsel %vm30_vm0, %v396_v30, 0.0  ;;  %v37_v40 = vadd.f32 %v36_v19, %v35_v31 }
   0x9   :  { %v43_v39 = vsel %vm30_vm0, %v401_v33, 0.0  ;;  %v56_v41 = vadd.f32 %v55_v26, %v54_v32  ;;  %v68_v46 = vmul.f32 %v396_v30, %v396_v30  ;;  %v72_v47 = vmul.f32 %v401_v33, %v401_v33 }
   0xa   :  { %v109_v44 = vsel %vm30_vm0, %v51_v36, 0.0  ;;  %v42_v45 = vadd.f32 %v41_v38, %v40_v37  ;;  %v103_v48 = vsel %vm30_vm0, %v37_v40, 0.0  ;;  %v82_v50 = vsel %vm30_vm0, %v60_v42, 0.0 }
   0xb   :  { %110 = vadd.xlane.f32.xlu1 %v109_v44  ;;  %v58_v49 = vadd.f32 %v57_v27, %v56_v41  ;;  %v83_v51 = vsel %vm30_vm0, %v64_v43, 0.0  ;;  %104 = vadd.xlane.f32.xlu0 %v103_v48  ;;  %v85_v54 = vsel %vm30_vm0, %v68_v46, 0.0  ;;  %v87_v55 = vsel %vm30_vm0, %v72_v47, 0.0 }
   0xc   :  { %v44_v52 = vadd.f32 %v43_v39, %v42_v45  ;;  %v84_v53 = vadd.f32 %v83_v51, %v82_v50  ;;  %v67_v59 = vmul.f32 %v340_v12, %v340_v12  ;;  %v71_v62 = vmul.f32 %v345_v13, %v345_v13 }
   0xd   :  { %v112_v56 = vsel %vm30_vm0, %v58_v49, 0.0  ;;  %v62_v63 = vmul.f32 %v354_v16, %v354_v16  ;;  %v75_v4 = vsel %vm30_vm0, %v59_v57, 0.0  ;;  %v76_v5 = vsel %vm30_vm0, %v63_v58, 0.0 }
   0xe   :  { %v106_v60 = vsel %vm30_vm0, %v44_v52, 0.0  ;;  %v86_v61 = vadd.f32 %v85_v54, %v84_v53  ;;  %v78_v6 = vsel %vm30_vm0, %v67_v59, 0.0  ;;  %v66_v10 = vmul.f32 %v363_v20, %v363_v20 }
   0xf   :  { %113 = vadd.xlane.f32.xlu1 %v112_v56  ;;  %107 = vadd.xlane.f32.xlu0 %v106_v60  ;;  %v77_v14 = vadd.f32 %v76_v5, %v75_v4  ;;  %v80_v15 = vsel %vm30_vm0, %v71_v62, 0.0  ;;  %v70_v17 = vmul.f32 %v368_v21, %v368_v21  ;;  %v74_v18 = vmul.f32 %v373_v22, %v373_v22 }
  0x10   :  { %v88_v11 = vadd.f32 %v87_v55, %v86_v61  ;;  %v96_v19 = vsel %vm30_vm0, %v62_v63, 0.0  ;;  %v97_v23 = vsel %vm30_vm0, %v66_v10, 0.0  ;;  %v65_v24 = vmul.f32 %v303_v1, %v303_v1 }
  0x11   :  { %v79_v26 = vadd.f32 %v78_v6, %v77_v14  ;;  %v98_v27 = vadd.f32 %v97_v23, %v96_v19  ;;  %v99_v31 = vsel %vm30_vm0, %v70_v17, 0.0  ;;  %v101_v32 = vsel %vm30_vm0, %v74_v18, 0.0 }
  0x12   :  { %v122_v25 = vsel %vm30_vm0, %v88_v11, 0.0  ;;  %v69_v34 = vmul.f32 %v308_v2, %v308_v2  ;;  %v73_v35 = vmul.f32 %v313_v3, %v313_v3  ;;  %v89_v36 = vsel %vm30_vm0, %v333_v9, 0.0 }
  0x13   :  { %123 = vadd.xlane.f32.xlu1 %v122_v25  ;;  %v81_v37 = vadd.f32 %v80_v15, %v79_v26  ;;  %v100_v38 = vadd.f32 %v99_v31, %v98_v27  ;;  %v90_v39 = vsel %vm30_vm0, %v65_v24, 0.0  ;;  %v274_v48 = vmov 0   ;;  %v152_v26 = vld [vmem:[%s571_s1 + $0x8] sm:$0xff] }
  0x14   :  { %v91_v40 = vadd.f32 %v90_v39, %v89_v36  ;;  %v92_v41 = vsel %vm30_vm0, %v69_v34, 0.0  ;;  %v94_v44 = vsel %vm30_vm0, %v73_v35, 0.0  ;;  %265 = vset.pattern.permute.xlu1 %v274_v48  ;;  %264 = vset.pattern.permute.xlu0 %v274_v48  ;;  %v153_v36 = vld [vmem:[%s571_s1 + $0x10] sm:$0xff] }
  0x15   :  { %v119_v42 = vsel %vm30_vm0, %v81_v37, 0.0  ;;  %v102_v43 = vadd.f32 %v101_v32, %v100_v38  ;;  %v151_v32 = vld [vmem:[%s571_s1] sm:$0xff]  ;;  %v161_v48 = vld [vmem:[%s572_s2 + $0x10] sm:$0xff] }
  0x16   :  { %120 = vadd.xlane.f32.xlu0 %v119_v42  ;;  %v93_v45 = vadd.f32 %v92_v41, %v91_v40  ;;  %v154_v40 = vld [vmem:[%s571_s1 + $0x18] sm:$0xff] }
  0x17   :  { %v128_v46 = vsel %vm30_vm0, %v102_v43, 0.0  ;;  %v159_v43 = vld [vmem:[%s572_s2] sm:$0xff] }
  0x18   :  { %129 = vadd.xlane.f32.xlu1 %v128_v46  ;;  %v95_v47 = vadd.f32 %v94_v44, %v93_v45  ;;  %v160_v46 = vld [vmem:[%s572_s2 + $0x8] sm:$0xff] }
  0x1a   :  { %v125_v9 = vsel %vm30_vm0, %v95_v47, 0.0 }
  0x1b   :  { %126 = vadd.xlane.f32.xlu0 %v125_v9 }
  0x94   :  { %v111_v49 = vpop.xlane.xlu1 %110  ;;  %v105_v50 = vpop.xlane.xlu0 %104 }
  0x95   :  { %v115_v55 = vmul.f32 0.03125, %v105_v50  ;;  %v117_v4 = vmul.f32 0.03125, %v111_v49 }
  0x97   :  { %v135_v61 = vmul.f32 %v115_v55, %v115_v55  ;;  %v137_v17 = vmul.f32 %v117_v4, %v117_v4 }
  0x98   :  { %v114_v51 = vpop.xlane.xlu1 %113  ;;  %v108_v52 = vpop.xlane.xlu0 %107 }
  0x99   :  { %v116_v53 = vmul.f32 0.03125, %v108_v52  ;;  %v118_v59 = vmul.f32 0.03125, %v114_v51  ;;  %v162_v51 = vld [vmem:[%s572_s2 + $0x18] sm:$0xff] }
  0x9b   :  { %v136_v56 = vmul.f32 %v116_v53, %v116_v53  ;;  %v138_v11 = vmul.f32 %v118_v59, %v118_v59 }
  0x9c   :  { %v124_v54 = vpop.xlane.xlu1 %123 }
  0x9d   :  { %v132_v57 = vmul.f32 0.03125, %v124_v54 }
  0x9f   :  { %v140_v58 = vsub.f32 %v132_v57, %v136_v56  ;;  %v121_v60 = vpop.xlane.xlu0 %120 }
  0xa0   :  { %v131_v63 = vmul.f32 0.03125, %v121_v60 }
  0xa1   :  { %v144_v62 = vadd.f32 1e-05, %v140_v58  ;;  %v130_v5 = vpop.xlane.xlu1 %129 }
  0xa2   :  { %v139_v6 = vsub.f32 %v131_v63, %v135_v61  ;;  %v134_v10 = vmul.f32 0.03125, %v130_v5 }
  0xa3   :  { %266 = vrsqrt.f32 %v144_v62 }
  0xa4   :  { %v143_v14 = vadd.f32 1e-05, %v139_v6  ;;  %v127_v15 = vpop.xlane.xlu0 %126  ;;  %v142_v18 = vsub.f32 %v134_v10, %v138_v11 }
  0xa5   :  { %v133_v19 = vmul.f32 0.03125, %v127_v15 }
  0xa6   :  { %268 = vrsqrt.f32 %v143_v14  ;;  %v146_v24 = vadd.f32 1e-05, %v142_v18 }
  0xa7   :  { %v141_v23 = vsub.f32 %v133_v19, %v137_v17 }
  0xa9   :  { %v145_v25 = vadd.f32 1e-05, %v141_v23 }
  0xab   :  { %270 = vrsqrt.f32 %v145_v25 }
  0xac   :  { %272 = vrsqrt.f32 %v146_v24 }
  0xb0   :  { %v267_v27 = vpop.eup %266 }
  0xb1   :  { %v156_v31 = vmul.f32 %v267_v27, %v152_v26 }
  0xb3   :  { %178 = vperm.xlu1 %265, %v156_v31   ;;  %v269_v34 = vpop.eup %268  ;;  %v164_v45 = vmul.f32 %v156_v31, %v116_v53 }
  0xb4   :  { %v155_v35 = vmul.f32 %v269_v34, %v151_v32 }
  0xb5   :  { %v168_v47 = vsub.f32 %v160_v46, %v164_v45 }
  0xb6   :  { %173 = vperm.xlu0 %264, %v155_v35   ;;  %v163_v42 = vmul.f32 %v155_v35, %v115_v55 }
  0xb8   :  { %v271_v37 = vpop.eup %270  ;;  %v167_v44 = vsub.f32 %v159_v43, %v163_v42 }
  0xb9   :  { %v157_v38 = vmul.f32 %v271_v37, %v153_v36  ;;  %v273_v39 = vpop.eup %272 }
  0xba   :  { %v158_v41 = vmul.f32 %v273_v39, %v154_v40 }
  0xbb   :  { %183 = vperm.xlu1 %265, %v157_v38   ;;  %v165_v9 = vmul.f32 %v157_v38, %v117_v4 }
  0xbc   :  { %v166_v50 = vmul.f32 %v158_v41, %v118_v59 }
  0xbd   :  { %v169_v49 = vsub.f32 %v161_v48, %v165_v9 }
  0xbe   :  { %v170_v52 = vsub.f32 %v162_v51, %v166_v50 }
  0xbf   :  { %188 = vperm.xlu1 %265, %v158_v41  }
  0xc3   :  { %209 = vperm.xlu1 %265, %v167_v44  }
  0xc7   :  { %214 = vperm.xlu1 %265, %v168_v47  }
  0xcb   :  { %219 = vperm.xlu1 %265, %v169_v49  }
  0xcf   :  { %224 = vperm.xlu1 %265, %v170_v52  }
 0x12e   :  { %v179_v53 = vpop.permute.xlu1 %178 }
 0x12f   :  { %v192_v6 = vmul.f32 %v179_v53, %v386_v28  ;;  %v196_v10 = vmul.f32 %v179_v53, %v391_v29  ;;  %v200_v11 = vmul.f32 %v179_v53, %v396_v30  ;;  %v204_v14 = vmul.f32 %v179_v53, %v401_v33 }
 0x131   :  { %v174_v55 = vpop.permute.xlu0 %173 }
 0x132   :  { %v191_v57 = vmul.f32 %v174_v55, %v324_v7  ;;  %v195_v58 = vmul.f32 %v174_v55, %v329_v8  ;;  %v199_v60 = vmul.f32 %v174_v55, %v340_v12  ;;  %v203_v61 = vmul.f32 %v174_v55, %v345_v13 }
 0x136   :  { %v184_v54 = vpop.permute.xlu1 %183 }
 0x137   :  { %v193_v29 = vmul.f32 %v184_v54, %v298_v0  ;;  %v197_v30 = vmul.f32 %v184_v54, %v303_v1  ;;  %v201_v33 = vmul.f32 %v184_v54, %v308_v2  ;;  %v205_v15 = vmul.f32 %v184_v54, %v313_v3 }
 0x13a   :  { %v189_v56 = vpop.permute.xlu1 %188 }
 0x13b   :  { %v194_v18 = vmul.f32 %v189_v56, %v354_v16  ;;  %v198_v19 = vmul.f32 %v189_v56, %v363_v20  ;;  %v202_v23 = vmul.f32 %v189_v56, %v368_v21  ;;  %v206_v24 = vmul.f32 %v189_v56, %v373_v22 }
 0x13e   :  { %v210_v59 = vpop.permute.xlu1 %209 }
 0x13f   :  { %v227_v62 = vadd.f32 %v210_v59, %v191_v57  ;;  %v231_v63 = vadd.f32 %v210_v59, %v195_v58  ;;  %v235_v4 = vadd.f32 %v210_v59, %v199_v60  ;;  %v239_v5 = vadd.f32 %v210_v59, %v203_v61 }
 0x141   :  { %243 = vst.msk [vmem:[%s573_s3] sm:$0xff] %vm30_vm0, %v227_v62  ;;  %247 = vst.msk [vmem:[%s573_s3 + $0x20] sm:$0xff] %vm30_vm0, %v231_v63 }
 0x142   :  { %251 = vst.msk [vmem:[%s573_s3 + $0x40] sm:$0xff] %vm30_vm0, %v235_v4  ;;  %255 = vst.msk [vmem:[%s573_s3 + $0x60] sm:$0xff] %vm30_vm0, %v239_v5  ;;  %v215_v7 = vpop.permute.xlu1 %214 }
 0x143   :  { %v228_v8 = vadd.f32 %v215_v7, %v192_v6  ;;  %v232_v12 = vadd.f32 %v215_v7, %v196_v10  ;;  %v236_v13 = vadd.f32 %v215_v7, %v200_v11  ;;  %v240_v28 = vadd.f32 %v215_v7, %v204_v14 }
 0x145   :  { %244 = vst.msk [vmem:[%s573_s3 + $0x8] sm:$0xff] %vm30_vm0, %v228_v8  ;;  %248 = vst.msk [vmem:[%s573_s3 + $0x28] sm:$0xff] %vm30_vm0, %v232_v12 }
 0x146   :  { %252 = vst.msk [vmem:[%s573_s3 + $0x48] sm:$0xff] %vm30_vm0, %v236_v13  ;;  %256 = vst.msk [vmem:[%s573_s3 + $0x68] sm:$0xff] %vm30_vm0, %v240_v28  ;;  %v220_v0 = vpop.permute.xlu1 %219 }
 0x147   :  { %v229_v1 = vadd.f32 %v220_v0, %v193_v29  ;;  %v233_v2 = vadd.f32 %v220_v0, %v197_v30  ;;  %v237_v3 = vadd.f32 %v220_v0, %v201_v33  ;;  %v241_v17 = vadd.f32 %v220_v0, %v205_v15 }
 0x149   :  { %245 = vst.msk [vmem:[%s573_s3 + $0x10] sm:$0xff] %vm30_vm0, %v229_v1  ;;  %249 = vst.msk [vmem:[%s573_s3 + $0x30] sm:$0xff] %vm30_vm0, %v233_v2 }
 0x14a   :  { %253 = vst.msk [vmem:[%s573_s3 + $0x50] sm:$0xff] %vm30_vm0, %v237_v3  ;;  %257 = vst.msk [vmem:[%s573_s3 + $0x70] sm:$0xff] %vm30_vm0, %v241_v17  ;;  %v225_v25 = vpop.permute.xlu1 %224 }
 0x14b   :  { %v230_v26 = vadd.f32 %v225_v25, %v194_v18  ;;  %v234_v27 = vadd.f32 %v225_v25, %v198_v19  ;;  %v238_v31 = vadd.f32 %v225_v25, %v202_v23  ;;  %v242_v32 = vadd.f32 %v225_v25, %v206_v24 }
 0x14d   :  { %246 = vst.msk [vmem:[%s573_s3 + $0x18] sm:$0xff] %vm30_vm0, %v230_v26  ;;  %250 = vst.msk [vmem:[%s573_s3 + $0x38] sm:$0xff] %vm30_vm0, %v234_v27 }
 0x14e   :  { %254 = vst.msk [vmem:[%s573_s3 + $0x58] sm:$0xff] %vm30_vm0, %v238_v31  ;;  %258 = vst.msk [vmem:[%s573_s3 + $0x78] sm:$0xff] %vm30_vm0, %v242_v32 }

</bundles_post_ra>
